<compile_context>
chip_gen: v7x
topology: tpu7x:2x2x1
jax: 0.10.0
libtpu: 0.0.40
codegen_flags: <defaults>
</compile_context>

<pallas_src>
import functools

import jax
import jax.numpy as jnp
from jax.experimental import pallas as pl
from jax.experimental.pallas import tpu as pltpu

DP = 128   # lane-dense padded feature dim (tokens-on-sublanes layout)
DT = 16    # sublane-padded feature dim  (tokens-on-lanes / transposed layout)


def _round_up(a, b):
    return ((a + b - 1) // b) * b


# ----------------------------------------------------------------------------
# Default layout: tokens on sublanes, features (padded to 128) on lanes.
# ----------------------------------------------------------------------------
def _moe_row_kernel(x_ref, w_ref, o_ref, *, mask_col):
    x = x_ref[...]                                                  # [TM, 128] f32
    # One 128x256 matmul: y[:, :128] = x @ W1p (+b1 via the bias column),
    # y[:, 128:] = x @ (W2p - W1p) = y2 - y1.  Mask/bias columns of x hit
    # zero weight rows, so they do not perturb the matmul.
    y = jnp.dot(x, w_ref[...], preferred_element_type=jnp.float32)  # [TM, 256]
    m = x[:, mask_col:mask_col + 1]                                 # [TM, 1] 0/1
    # Arithmetic select: exact for m in {0,1} (unlike jnp.where it would
    # propagate NaN/Inf from the non-selected expert -- fine for Linear experts).
    o_ref[...] = (y[:, :DP] + m * y[:, DP:]).astype(o_ref.dtype)


def _moe_forward_rows(x, w1, b1, w2, b2, path_ids, *, max_tm=2048):
    n, d = x.shape
    d_out = w1.shape[0]
    assert d + 2 <= DP and d_out <= DP
    f32 = jnp.float32

    # Token tile: multiple of 8, capped at max_tm; force >=2 grid steps on
    # large N so the "parallel" axis shards across both TensorCores on v7x.
    tm = min(max_tm, _round_up(n, 8))
    if n >= 64:
        tm = min(tm, _round_up(pl.cdiv(n, 2), 8))
    grid = (pl.cdiv(n, tm),)

    # x slab [n, 128]: features | "1" bias column at d | routing mask at d+1.
    x_p = jnp.zeros((n, DP), dtype=f32)
    x_p = x_p.at[:, :d].set(x.astype(f32))
    x_p = x_p.at[:, d].set(1.0)
    x_p = x_p.at[:, d + 1].set((path_ids == 1).astype(f32))

    # W1 | (W2 - W1) packed side by side -> one resident [128, 256] tile.
    def pack_w(w, b):
        wp = jnp.zeros((DP, DP), dtype=f32)
        wp = wp.at[:d, :d_out].set(w.T.astype(f32))
        wp = wp.at[d, :d_out].set(b.astype(f32))
        return wp

    w1_p = pack_w(w1, b1)
    w_cat = jnp.concatenate([w1_p, pack_w(w2, b2) - w1_p], axis=1)  # [128, 256]

    row_spec = pl.BlockSpec((tm, DP), lambda i: (i, 0))
    w_spec = pl.BlockSpec((DP, 2 * DP), lambda i: (0, 0))           # resident

    cost = pl.CostEstimate(
        flops=2 * n * DP * 2 * DP + 2 * n * DP,
        transcendentals=0,
        bytes_accessed=4 * (2 * n * DP + DP * 2 * DP),
    )

    out = pl.pallas_call(
        functools.partial(_moe_row_kernel, mask_col=d + 1),
        out_shape=jax.ShapeDtypeStruct((n, DP), x.dtype),
        grid_spec=pltpu.PrefetchScalarGridSpec(
            num_scalar_prefetch=0,
            grid=grid,
            in_specs=[row_spec, w_spec],
            out_specs=row_spec,
        ),
        compiler_params=pltpu.CompilerParams(dimension_semantics=("parallel",)),
        cost_estimate=cost,
    )(x_p, w_cat)

    return out[:, :d_out]


# ----------------------------------------------------------------------------
# Transposed layout: tokens on lanes, features (padded to 16) on sublanes.
# Streams ~8x fewer x/out bytes since the 10->128 zero padding is gone.
# ----------------------------------------------------------------------------
def _moe_col_kernel(xt_ref, w_ref, o_ref, *, mask_row):
    xt = xt_ref[...]                                                 # [16, TN]
    w = w_ref[...]                                                   # [32, 16]
    y = jnp.dot(w, xt, preferred_element_type=jnp.float32)           # [32, TN]
    m = xt[mask_row:mask_row + 1, :]                                 # [1, TN] 0/1
    o_ref[...] = (y[:DT, :] + m * y[DT:, :]).astype(o_ref.dtype)


def _moe_forward_cols(x, w1, b1, w2, b2, path_ids, *, max_tn=32768):
    n, d = x.shape
    d_out = w1.shape[0]
    assert d + 2 <= DT and d_out <= DT
    f32 = jnp.float32

    n_pad = _round_up(n, 128)
    tn = min(max_tn, n_pad)
    if n_pad >= 256:
        tn = min(tn, _round_up(pl.cdiv(n_pad, 2), 128))
    grid = (pl.cdiv(n_pad, tn),)

    # x^T slab [16, n_pad]: rows 0..d-1 features, row d bias "1", row d+1 mask.
    xt = jnp.zeros((DT, n_pad), dtype=f32)
    xt = xt.at[:d, :n].set(x.T.astype(f32))
    xt = xt.at[d, :n].set(1.0)
    xt = xt.at[d + 1, :n].set((path_ids == 1).astype(f32))

    # y^T = Wp^T @ x^T; Wp^T is just W with the bias as an extra column.
    def pack_wt(w, b):
        wp = jnp.zeros((DT, DT), dtype=f32)
        wp = wp.at[:d_out, :d].set(w.astype(f32))
        wp = wp.at[:d_out, d].set(b.astype(f32))
        return wp

    w1_t = pack_wt(w1, b1)
    w_cat = jnp.concatenate([w1_t, pack_wt(w2, b2) - w1_t], axis=0)  # [32, 16]

    col_spec = pl.BlockSpec((DT, tn), lambda i: (0, i))
    w_spec = pl.BlockSpec((2 * DT, DT), lambda i: (0, 0))            # resident

    cost = pl.CostEstimate(
        flops=2 * (2 * DT) * DT * n_pad + 2 * DT * n_pad,
        transcendentals=0,
        bytes_accessed=4 * (2 * DT * n_pad + 2 * DT * DT),
    )

    out = pl.pallas_call(
        functools.partial(_moe_col_kernel, mask_row=d + 1),
        out_shape=jax.ShapeDtypeStruct((DT, n_pad), x.dtype),
        grid_spec=pltpu.PrefetchScalarGridSpec(
            num_scalar_prefetch=0,
            grid=grid,
            in_specs=[col_spec, w_spec],
            out_specs=col_spec,
        ),
        compiler_params=pltpu.CompilerParams(dimension_semantics=("parallel",)),
        cost_estimate=cost,
    )(xt, w_cat)

    return out[:d_out, :n].T


def moe_forward(x, w1, b1, w2, b2, path_ids, *, max_tm=2048, transposed=False):
    """x: [N, D]; w*: [D_out, D_in] (PyTorch layout); b*: [D_out]; path_ids: [N]."""
    if transposed:
        return _moe_forward_cols(x, w1, b1, w2, b2, path_ids)
    return _moe_forward_rows(x, w1, b1, w2, b2, path_ids, max_tm=max_tm)


def moe_reference(x, w1, b1, w2, b2, path_ids):
    y1 = x @ w1.T + b1
    y2 = x @ w2.T + b2
    return jnp.where(path_ids[:, None] == 0, y1, y2)


if __name__ == "__main__":
    key = jax.random.PRNGKey(0)
    k_x, k_w1, k_b1, k_w2, k_b2, k_route = jax.random.split(key, 6)

    N, D = 8, 10                      # seq=8 tokens, hidden=10 (Linear(10, 10))
    x = jax.random.normal(k_x, (N, D), dtype=jnp.float32)

    # Deterministic parameter init (PyTorch nn.Linear shapes: W [10,10], b [10]).
    w1 = jax.random.normal(k_w1, (D, D), dtype=jnp.float32) * 0.1
    b1 = jax.random.normal(k_b1, (D,), dtype=jnp.float32) * 0.1
    w2 = jax.random.normal(k_w2, (D, D), dtype=jnp.float32) * 0.1
    b2 = jax.random.normal(k_b2, (D,), dtype=jnp.float32) * 0.1

    # RandScatter(rand_path_num=2): random per-token path id in {0, 1}.
    # TODO(synk): torch's RNG-driven routing has no Pallas equivalent; the
    # routing decision is made deterministically with jax.random outside the kernel.
    path_ids = jax.random.randint(k_route, (N,), 0, 2, dtype=jnp.int32)

    ref = moe_reference(x, w1, b1, w2, b2, path_ids)

    out_row = jax.block_until_ready(moe_forward(x, w1, b1, w2, b2, path_ids))
    assert out_row.shape == (N, D)
    assert jnp.allclose(out_row, ref, atol=1e-5, rtol=1e-5)

    out_col = jax.block_until_ready(
        moe_forward(x, w1, b1, w2, b2, path_ids, transposed=True))
    assert out_col.shape == (N, D)
    assert jnp.allclose(out_col, ref, atol=1e-5, rtol=1e-5)

    print("KERNEL_OK")
</pallas_src>

<mosaic_0001>
module attributes {stable_mosaic.version = 11 : i64} {
  func.func @_moe_row_kernel(%arg0: i32, %arg1: memref<8x128xf32, #tpu.memory_space<vmem>>, %arg2: memref<128x256xf32, #tpu.memory_space<vmem>>, %arg3: memref<8x128xf32, #tpu.memory_space<vmem>>) attributes {dimension_semantics = [#tpu.dimension_semantics<parallel>], iteration_bounds = array<i64: 1>, scalar_prefetch = 0 : i64, scratch_operands = 0 : i64, tpu.core_type = #tpu.core_type<tc>, window_params = [{transform_indices = @transform_0, window_bounds = array<i64: 8, 128>}, {pipeline_mode = #tpu.pipeline_mode<synchronous>, transform_indices = @transform_1, window_bounds = array<i64: 128, 256>}, {transform_indices = @transform_2, window_bounds = array<i64: 8, 128>}]} {
    %c0 = arith.constant 0 : index
    %c0_0 = arith.constant 0 : index
    %0 = vector.load %arg1[%c0, %c0_0] : memref<8x128xf32, #tpu.memory_space<vmem>>, vector<8x128xf32>
    %c0_1 = arith.constant 0 : index
    %c0_2 = arith.constant 0 : index
    %1 = vector.load %arg2[%c0_1, %c0_2] : memref<128x256xf32, #tpu.memory_space<vmem>>, vector<128x256xf32>
    %cst = arith.constant dense<0.000000e+00> : vector<8x256xf32>
    %2 = tpu.matmul %0, %1, %cst {dimension_numbers = #tpu.dot_dimension_numbers<[1], [0], [0], [1], [0, 0, 1, 1], [], []>} : vector<8x128xf32>, vector<128x256xf32>, vector<8x256xf32> -> vector<8x256xf32>
    %3 = vector.extract_strided_slice %0 {offsets = [0, 11], sizes = [8, 1], strides = [1, 1]} : vector<8x128xf32> to vector<8x1xf32>
    %4 = vector.extract_strided_slice %2 {offsets = [0, 0], sizes = [8, 128], strides = [1, 1]} : vector<8x256xf32> to vector<8x128xf32>
    %5 = vector.extract_strided_slice %2 {offsets = [0, 128], sizes = [8, 128], strides = [1, 1]} : vector<8x256xf32> to vector<8x128xf32>
    %6 = vector.broadcast %3 : vector<8x1xf32> to vector<8x128xf32>
    %7 = arith.mulf %6, %5 : vector<8x128xf32>
    %8 = arith.addf %4, %7 : vector<8x128xf32>
    %c0_3 = arith.constant 0 : index
    %c0_4 = arith.constant 0 : index
    %9 = vector.load %arg3[%c0_3, %c0_4] : memref<8x128xf32, #tpu.memory_space<vmem>>, vector<8x128xf32>
    tpu.vector_store %arg3[%c0_3, %c0_4], %8 {strides = array<i32>} : memref<8x128xf32, #tpu.memory_space<vmem>>, vector<8x128xf32>,
    return
  }
  func.func @transform_0(%arg0: i32) -> (i32, i32) {
    %c0_i32 = arith.constant 0 : i32
    %c0_i32_0 = arith.constant 0 : i32
    return %arg0, %c0_i32 : i32, i32
  }
  func.func @transform_1(%arg0: i32) -> (i32, i32) {
    %c0_i32 = arith.constant 0 : i32
    %c0_i32_0 = arith.constant 0 : i32
    %c0_i32_1 = arith.constant 0 : i32
    return %c0_i32, %c0_i32_0 : i32, i32
  }
  func.func @transform_2(%arg0: i32) -> (i32, i32) {
    %c0_i32 = arith.constant 0 : i32
    %c0_i32_0 = arith.constant 0 : i32
    return %arg0, %c0_i32 : i32, i32
  }
}

</mosaic_0001>

<bundles_post_ra>
// kernel: tpu_custom_call.1
= control target key start
LH: loop header
LB: loop body
LE: loop exit
PB: predicated region body
PF: predicated region fallthrough
CT: control target
= control target key end

     0   :  { %7 = vsyncpa [#allocation3], 0  ;;  %s343_s0 = inlined_call_operand.hbm [shape: f32[8,128], index: 0, kind: input, shape index: {}]   ;;  %s344_s1 = inlined_call_operand.hbm [shape: f32[128,256], index: 1, kind: input, shape index: {}]   ;;  %s345_s2 = inlined_call_operand.hbm [shape: f32[8,128], index: 2, kind: output, shape index: {}]  }
   0x1   :  { %8 = vsyncpa [#allocation6], 0 }
   0x2   :  { %9 = vsyncpa [#allocation4], 0  ;;  %s278_s9 = smov [#allocation2]   ;;  %s279_s11 = smov [#allocation5]  }
   0x3   :  { %s16_s10 = sshll.u32 %s278_s9, 4  ;;  %s25_s12 = sshll.u32 %s279_s11, 4  ;;  %s17_s10 = int_to_ptr.vmem [resolvable:$true] %s16_s10  ;;  %s300_s12 = int_to_ptr.vmem [resolvable:$true] %s25_s12 }
   0x4   :  { %s206_s15 = scalar_lea.hbm %s343_s0, 128 }
   0x5   :  { %p207_p0 = scmp.ne.s32.totalorder %s343_s0, %s206_s15  ;;  %p210_p1 = scmp.lt.u32.totalorder %s206_s15, %s343_s0 }
   0x7   :  { %p212_p2 = pnand %p210_p1, %p207_p0 }
   0x9   :  { %215 = shalt.err (!%p212_p2)
}
   0xa   :  { %s216_s20 = scalar_lea.vmem %s17_s10, 128  ;;  %p221_p4 = scmp.lt.s32.totalorder %s17_s10, %s17_s10 }
   0xb   :  { %p217_p3 = scmp.ne.s32.totalorder %s17_s10, %s216_s20  ;;  %p222_p5 = scmp.lt.s32.totalorder %s216_s20, %s216_s20 }
   0xd   :  { %p223_p6 = por %p222_p5, %p221_p4 }
   0xf   :  { %p224_p7 = pnand %p223_p6, %p217_p3 }
  0x11   :  { %227 = shalt.err (!%p224_p7)
}
  0x12   :  { %19 = dma.hbm_to_vmem [thread:$0]  %s343_s0, 128, %s17_s10, [#allocation3]  }
  0x13   :  { %s228_s25 = scalar_lea.hbm %s344_s1, 4096 }
  0x14   :  { %p229_p8 = scmp.ne.s32.totalorder %s344_s1, %s228_s25  ;;  %p232_p9 = scmp.lt.u32.totalorder %s228_s25, %s344_s1 }
  0x16   :  { %p234_p10 = pnand %p232_p9, %p229_p8 }
  0x18   :  { %237 = shalt.err (!%p234_p10)
}
  0x19   :  { %s238_s30 = scalar_lea.vmem %s300_s12, 4096  ;;  %p243_p12 = scmp.lt.s32.totalorder %s300_s12, %s300_s12 }
  0x1a   :  { %p239_p11 = scmp.ne.s32.totalorder %s300_s12, %s238_s30  ;;  %p244_p13 = scmp.lt.s32.totalorder %s238_s30, %s238_s30 }
  0x1c   :  { %p245_p0 = por %p244_p13, %p243_p12 }
  0x1e   :  { %p246_p1 = pnand %p245_p0, %p239_p11 }
  0x20   :  { %249 = shalt.err (!%p246_p1)
}
  0x21   :  { %s280_s0 = smov 256   ;;  %s281_s3 = smov 16  }
  0x22   :  { %31 = dma.hbm_to_vmem [thread:$0]  %s344_s1, 4096, %s300_s12, [#allocation6], %s280_s0, %s280_s0, %s281_s3  }
  0x23   :  { %272 = dma.done.wait [#allocation3], 128  }
  0x24   :  { %273 = vsyncadd [#allocation3], 4294967168 }
  0x25   :  { %274 = dma.done.wait [#allocation6], 4096  }
  0x26   :  { %275 = vsyncadd [#allocation6], 4294963200  ;;  %v282_v0 = vmov 0.0   ;;  %v283_v1 = vmov 11   ;;  %v40_v2 = vld [vmem:[#allocation5 + $0x8] sm:$0xff]  ;;  %v42_v3 = vld [vmem:[#allocation5 + $0x18] sm:$0xff] }
  0x27   :  { %135 = vmatprep.mubr.f32.mxu0 %v282_v0  ;;  %205 = vset.pattern.permute.xlu0 %v283_v1  ;;  %v39_v4 = vld [vmem:[#allocation5] sm:$0xff]  ;;  %v166_v5 = vpack.c.bf16 %v42_v3, %v40_v2  ;;  %v41_v6 = vld [vmem:[#allocation5 + $0x10] sm:$0xff]  ;;  %v44_v7 = vld [vmem:[#allocation5 + $0x28] sm:$0xff]  ;;  %s284_s1 = smov [#allocation7]  }
  0x28   :  { %v46_v8 = vld [vmem:[#allocation5 + $0x38] sm:$0xff]  ;;  %v168_v9 = vpack.c.bf16 %v41_v6, %v39_v4  ;;  %v43_v11 = vld [vmem:[#allocation5 + $0x20] sm:$0xff]  ;;  %v45_v12 = vld [vmem:[#allocation5 + $0x30] sm:$0xff]  ;;  %s156_s6 = sshll.u32 %s284_s1, 4  ;;  %s157_s6 = int_to_ptr.vmem [resolvable:$true] %s156_s6 }
  0x29   :  { %v170_v10 = vpack.c.bf16 %v46_v8, %v44_v7  ;;  %v48_v13 = vld [vmem:[#allocation5 + $0x48] sm:$0xff]  ;;  %167 = vmatprep.subr.bf16.mxu0 %v166_v5  ;;  %v50_v14 = vld [vmem:[#allocation5 + $0x58] sm:$0xff]  ;;  %v172_v15 = vpack.c.bf16 %v45_v12, %v43_v11  ;;  %v47_v17 = vld [vmem:[#allocation5 + $0x40] sm:$0xff]  ;;  %s250_s7 = scalar_lea.vmem %s157_s6, 128  ;;  %p255_p3 = scmp.lt.s32.totalorder %s157_s6, %s157_s6 }
  0x2a   :  { %169 = vmatpush1.bf16.msra.mxu0 %v168_v9  ;;  %v174_v16 = vpack.c.bf16 %v50_v14, %v48_v13  ;;  %v49_v18 = vld [vmem:[#allocation5 + $0x50] sm:$0xff]  ;;  %v52_v19 = vld [vmem:[#allocation5 + $0x68] sm:$0xff]  ;;  %v54_v20 = vld [vmem:[#allocation5 + $0x78] sm:$0xff]  ;;  %p251_p2 = scmp.ne.s32.totalorder %s157_s6, %s250_s7  ;;  %p256_p4 = scmp.lt.s32.totalorder %s250_s7, %s250_s7 }
  0x2b   :  { %171 = vmatprep.subr.bf16.mxu0 %v170_v10  ;;  %v176_v21 = vpack.c.bf16 %v49_v18, %v47_v17  ;;  %v178_v22 = vpack.c.bf16 %v54_v20, %v52_v19  ;;  %v51_v23 = vld [vmem:[#allocation5 + $0x60] sm:$0xff]  ;;  %v53_v24 = vld [vmem:[#allocation5 + $0x70] sm:$0xff]  ;;  %v56_v25 = vld [vmem:[#allocation5 + $0x88] sm:$0xff] }
  0x2c   :  { %v58_v26 = vld [vmem:[#allocation5 + $0x98] sm:$0xff]  ;;  %v180_v28 = vpack.c.bf16 %v53_v24, %v51_v23  ;;  %v55_v30 = vld [vmem:[#allocation5 + $0x80] sm:$0xff]  ;;  %v57_v31 = vld [vmem:[#allocation5 + $0x90] sm:$0xff]  ;;  %p257_p5 = por %p256_p4, %p255_p3 }
  0x2d   :  { %v38_v27 = vld [vmem:[#allocation2] sm:$0xff]  ;;  %v182_v29 = vpack.c.bf16 %v58_v26, %v56_v25  ;;  %v60_v32 = vld [vmem:[#allocation5 + $0xa8] sm:$0xff]  ;;  %v184_v34 = vpack.c.bf16 %v57_v31, %v55_v30  ;;  %v59_v36 = vld [vmem:[#allocation5 + $0xa0] sm:$0xff] }
  0x2e   :  { %173 = vmatpush1.bf16.msra.mxu0 %v172_v15  ;;  %144 = vperm.xlu0 %205, %v38_v27   ;;  %v62_v33 = vld [vmem:[#allocation5 + $0xb8] sm:$0xff]  ;;  %v61_v37 = vld [vmem:[#allocation5 + $0xb0] sm:$0xff]  ;;  %v64_v38 = vld [vmem:[#allocation5 + $0xc8] sm:$0xff]  ;;  %p258_p6 = pnand %p257_p5, %p251_p2 }
  0x2f   :  { %175 = vmatprep.subr.bf16.mxu0 %v174_v16  ;;  %v186_v35 = vpack.c.bf16 %v62_v33, %v60_v32  ;;  %v66_v39 = vld [vmem:[#allocation5 + $0xd8] sm:$0xff]  ;;  %v188_v40 = vpack.c.bf16 %v61_v37, %v59_v36  ;;  %v63_v42 = vld [vmem:[#allocation5 + $0xc0] sm:$0xff]  ;;  %v65_v43 = vld [vmem:[#allocation5 + $0xd0] sm:$0xff] }
  0x30   :  { %v190_v41 = vpack.c.bf16 %v66_v39, %v64_v38  ;;  %v68_v44 = vld [vmem:[#allocation5 + $0xe8] sm:$0xff]  ;;  %v70_v45 = vld [vmem:[#allocation5 + $0xf8] sm:$0xff]  ;;  %v192_v46 = vpack.c.bf16 %v65_v43, %v63_v42  ;;  %v67_v48 = vld [vmem:[#allocation5 + $0xe0] sm:$0xff] }
  0x31   :  { %v194_v47 = vpack.c.bf16 %v70_v45, %v68_v44  ;;  %v69_v49 = vld [vmem:[#allocation5 + $0xf0] sm:$0xff] }
  0x32   :  { %177 = vmatpush1.bf16.msra.mxu0 %v176_v21  ;;  %v196_v50 = vpack.c.bf16 %v69_v49, %v67_v48 }
  0x33   :  { %179 = vmatprep.subr.bf16.mxu0 %v178_v22 }
  0x36   :  { %181 = vmatpush1.bf16.msra.mxu0 %v180_v28 }
  0x37   :  { %183 = vmatprep.subr.bf16.mxu0 %v182_v29 }
  0x3a   :  { %185 = vmatpush1.bf16.msra.mxu0 %v184_v34 }
  0x3b   :  { %187 = vmatprep.subr.bf16.mxu0 %v186_v35 }
  0x3e   :  { %189 = vmatpush1.bf16.msra.mxu0 %v188_v40 }
  0x3f   :  { %191 = vmatprep.subr.bf16.mxu0 %v190_v41 }
  0x42   :  { %193 = vmatpush1.bf16.msra.mxu0 %v192_v46 }
  0x43   :  { %195 = vmatprep.subr.bf16.mxu0 %v194_v47 }
  0x46   :  { %197 = vmatpush1.bf16.msra.mxu0 %v196_v50 }
  0x49   :  { %136 = vmatmul.mubr.f32.vlgmr.msra.gmra.mrb[0].mxu0 %v38_v27 }
  0xad   :  { %v145_v51 = vpop.permute.xlu0 %144 }
 0x11c   :  { %v137_v52 = vpop.f32.mrb[0].mxu0 }
 0x11d   :  { %v139_v53 = vpop.f32.mrb[1].mxu0 }
 0x11e   :  { %v147_v54 = vmul.f32 %v145_v51, %v139_v53 }
 0x120   :  { %v148_v55 = vadd.f32 %v147_v54, %v137_v52 }
 0x122   :  { %149 = vst [vmem:[#allocation7] sm:$0xff] %v148_v55 }
 0x123   :  { %261 = shalt.err (!%p258_p6)
}
 0x124   :  { %s262_s10 = scalar_lea.hbm %s345_s2, 128 }
 0x125   :  { %p263_p7 = scmp.ne.s32.totalorder %s345_s2, %s262_s10  ;;  %p266_p8 = scmp.lt.u32.totalorder %s262_s10, %s345_s2 }
 0x127   :  { %p268_p9 = pnand %p266_p8, %p263_p7 }
 0x129   :  { %271 = shalt.err (!%p268_p9)
}
 0x12a   :  { %159 = dma.vmem_to_hbm [thread:$0]  %s157_s6, 128, %s345_s2, [#allocation4]  }
 0x12b   :  { %276 = dma.done.wait [#allocation4], 128  }
 0x12c   :  { %277 = vsyncadd [#allocation4], 4294967168 }
 0x12d   :  { %163 = vsyncpa [#allocation3], 1 }
 0x12e   :  { %164 = vsyncpa [#allocation6], 1 }
 0x12f   :  { %165 = vsyncpa [#allocation4], 1 }

</bundles_post_ra>
